<compile_context>
chip_gen: v6e
topology: v6e:2x2x1
jax: 0.10.0
libtpu: 0.0.40
codegen_flags: <defaults>
</compile_context>

<pallas_src>
import jax
import jax.numpy as jnp
from jax.experimental import pallas as pl
from jax.experimental.pallas import tpu as pltpu


def _scse_kernel(x_ref, w1_ref, b1_ref, w2t_ref, b2_ref, ws_ref, bs_ref, o_ref):
    # x_ref / o_ref: (C, HW)   -- one batch image, channels on sublanes,
    #                              flattened spatial on lanes (lane-dense).
    x = x_ref[...].astype(jnp.float32)                         # (C, HW)

    # ---- cSE: global average pool over spatial (lane reduce) -------------
    m = jnp.mean(x, axis=1, keepdims=True)                     # (C, 1)

    # FC1: (1, mid) = sum_c W1[c, j] * m[c]   (sublane reduce, tiny)
    z = jnp.sum(w1_ref[...] * m, axis=0, keepdims=True) + b1_ref[...]   # (1, mid)
    z = jnp.maximum(z, 0.0)                                    # ReLU

    # FC2 (weights stored pre-transposed as (C, mid)): lane reduce over mid
    c_logit = jnp.sum(w2t_ref[...] * z, axis=1, keepdims=True) + b2_ref[...]  # (C, 1)
    c_scale = 1.0 / (1.0 + jnp.exp(-c_logit))                  # sigmoid, (C, 1)

    # ---- sSE: 1x1 conv C -> 1 over the channel (sublane) axis -------------
    s_logit = jnp.sum(x * ws_ref[...], axis=0, keepdims=True) + bs_ref[...]   # (1, HW)
    s_scale = 1.0 / (1.0 + jnp.exp(-s_logit))                  # sigmoid, (1, HW)

    # ---- fused gates: x*cSE + x*sSE == x * (cSE + sSE) ---------------------
    o_ref[...] = (x * (c_scale + s_scale)).astype(o_ref.dtype)


def scse_forward(x, kernel_params):
    """x: (B, C, H, W) NCHW (PyTorch convention)."""
    B, C, H, W = x.shape
    HW = H * W
    w1, b1, w2t, b2, ws, bs = kernel_params
    mid = w1.shape[1]

    # NCHW -> (B, C, H*W): pure reshape, no transpose (HW is already minor).
    x_flat = x.reshape(B, C, HW)

    out_flat = pl.pallas_call(
        _scse_kernel,
        out_shape=jax.ShapeDtypeStruct((B, C, HW), x.dtype),
        grid_spec=pltpu.PrefetchScalarGridSpec(
            num_scalar_prefetch=0,
            grid=(B,),
            in_specs=[
                pl.BlockSpec((None, C, HW), lambda b: (b, 0, 0)),   # x slab
                pl.BlockSpec((C, mid), lambda b: (0, 0)),           # W1   (C, mid)
                pl.BlockSpec((1, mid), lambda b: (0, 0)),           # b1
                pl.BlockSpec((C, mid), lambda b: (0, 0)),           # W2^T (C, mid)
                pl.BlockSpec((C, 1), lambda b: (0, 0)),             # b2
                pl.BlockSpec((C, 1), lambda b: (0, 0)),             # w_sSE
                pl.BlockSpec((1, 1), lambda b: (0, 0)),             # b_sSE
            ],
            out_specs=pl.BlockSpec((None, C, HW), lambda b: (b, 0, 0)),
        ),
        compiler_params=pltpu.CompilerParams(
            dimension_semantics=("parallel",)),
    )(x_flat, w1, b1, w2t, b2, ws, bs)

    return out_flat.reshape(B, C, H, W)


# --------------------------------------------------------------------------
# Parameter construction (deterministic, synthetic) + kernel-layout repack
# --------------------------------------------------------------------------
def make_params(key, C, reduction=16):
    mid = C // reduction
    ks = jax.random.split(key, 6)
    n = lambda k, s, sc=0.2: (sc * jax.random.normal(k, s)).astype(jnp.float32)

    # raw PyTorch-shaped parameters
    w1c = n(ks[0], (mid, C, 1, 1))     # cSE conv1: C -> mid
    b1c = n(ks[1], (mid,))
    w2c = n(ks[2], (C, mid, 1, 1))     # cSE conv2: mid -> C
    b2c = n(ks[3], (C,))
    wsc = n(ks[4], (1, C, 1, 1))       # sSE conv:  C -> 1
    bsc = n(ks[5], (1,))
    raw = (w1c, b1c, w2c, b2c, wsc, bsc)

    # kernel layout
    w1_k = jnp.transpose(w1c[:, :, 0, 0], (1, 0))   # (C, mid)
    b1_k = b1c.reshape(1, mid)
    w2t_k = w2c[:, :, 0, 0]                         # (C, mid)  == W2^T
    b2_k = b2c.reshape(C, 1)
    ws_k = wsc[0, :, 0, 0].reshape(C, 1)
    bs_k = bsc.reshape(1, 1)
    kernel_params = (w1_k, b1_k, w2t_k, b2_k, ws_k, bs_k)
    return raw, kernel_params


# --------------------------------------------------------------------------
# Pure-JAX reference, independent of the kernel path
# --------------------------------------------------------------------------
def ref_forward(x, raw):
    w1c, b1c, w2c, b2c, wsc, bsc = raw
    # cSE
    m = jnp.mean(x, axis=(2, 3), keepdims=True)                              # (B,C,1,1)
    z = jnp.einsum("bchw,oc->bohw", m, w1c[:, :, 0, 0]) + b1c[None, :, None, None]
    z = jnp.maximum(z, 0.0)
    c = jnp.einsum("bohw,co->bchw", z, w2c[:, :, 0, 0]) + b2c[None, :, None, None]
    c = jax.nn.sigmoid(c)                                                    # (B,C,1,1)
    # sSE
    s = jnp.einsum("bchw,oc->bohw", x, wsc[:, :, 0, 0]) + bsc[None, :, None, None]
    s = jax.nn.sigmoid(s)                                                    # (B,1,H,W)
    return x * c + x * s


if __name__ == "__main__":
    B, C, H, W = 2, 32, 16, 16     # in_channels=32, reduction=16 -> mid=2
    reduction = 16

    key = jax.random.PRNGKey(0)
    kx, kp = jax.random.split(key, 2)
    x = jax.random.normal(kx, (B, C, H, W), dtype=jnp.float32)

    raw, kernel_params = make_params(kp, C, reduction)

    out = scse_forward(x, kernel_params)
    out = jax.block_until_ready(out)

    ref = jax.block_until_ready(ref_forward(x, raw))
    assert out.shape == (B, C, H, W)
    assert jnp.allclose(out, ref, atol=1e-5, rtol=1e-5), (
        f"max err {jnp.max(jnp.abs(out - ref))}")

    print("KERNEL_OK")
</pallas_src>

<mosaic_0001>
module attributes {stable_mosaic.version = 11 : i64} {
  func.func @_scse_kernel(%arg0: i32, %arg1: memref<1x32x256xf32, #tpu.memory_space<vmem>>, %arg2: memref<32x2xf32, #tpu.memory_space<vmem>>, %arg3: memref<1x2xf32, #tpu.memory_space<vmem>>, %arg4: memref<32x2xf32, #tpu.memory_space<vmem>>, %arg5: memref<32x1xf32, #tpu.memory_space<vmem>>, %arg6: memref<32x1xf32, #tpu.memory_space<vmem>>, %arg7: memref<1x1xf32, #tpu.memory_space<vmem>>, %arg8: memref<1x32x256xf32, #tpu.memory_space<vmem>>) attributes {dimension_semantics = [#tpu.dimension_semantics<parallel>], iteration_bounds = array<i64: 2>, scalar_prefetch = 0 : i64, scratch_operands = 0 : i64, tpu.core_type = #tpu.core_type<tc>, window_params = [{transform_indices = @transform_0, window_bounds = array<i64: 1, 32, 256>}, {pipeline_mode = #tpu.pipeline_mode<synchronous>, transform_indices = @transform_1, window_bounds = array<i64: 32, 2>}, {pipeline_mode = #tpu.pipeline_mode<synchronous>, transform_indices = @transform_2, window_bounds = array<i64: 1, 2>}, {pipeline_mode = #tpu.pipeline_mode<synchronous>, transform_indices = @transform_3, window_bounds = array<i64: 32, 2>}, {pipeline_mode = #tpu.pipeline_mode<synchronous>, transform_indices = @transform_4, window_bounds = array<i64: 32, 1>}, {pipeline_mode = #tpu.pipeline_mode<synchronous>, transform_indices = @transform_5, window_bounds = array<i64: 32, 1>}, {pipeline_mode = #tpu.pipeline_mode<synchronous>, transform_indices = @transform_6, window_bounds = array<i64: 1, 1>}, {transform_indices = @transform_7, window_bounds = array<i64: 1, 32, 256>}]} {
    %c0 = arith.constant 0 : index
    %c0_0 = arith.constant 0 : index
    %c0_1 = arith.constant 0 : index
    %0 = vector.load %arg1[%c0, %c0_0, %c0_1] : memref<1x32x256xf32, #tpu.memory_space<vmem>>, vector<1x32x256xf32>
    %1 = vector.shape_cast %0 : vector<1x32x256xf32> to vector<32x256xf32>
    %cst = arith.constant dense<0.000000e+00> : vector<32xf32>
    %2 = vector.multi_reduction <add>, %1, %cst [1] : vector<32x256xf32> to vector<32xf32>
    %3 = vector.shape_cast %2 : vector<32xf32> to vector<32x1xf32>
    %cst_2 = arith.constant 2.560000e+02 : f32
    %4 = vector.broadcast %cst_2 : f32 to vector<32x1xf32>
    %5 = arith.divf %3, %4 : vector<32x1xf32>
    %c0_3 = arith.constant 0 : index
    %c0_4 = arith.constant 0 : index
    %6 = vector.load %arg2[%c0_3, %c0_4] : memref<32x2xf32, #tpu.memory_space<vmem>>, vector<32x2xf32>
    %7 = vector.broadcast %5 : vector<32x1xf32> to vector<32x2xf32>
    %8 = arith.mulf %6, %7 : vector<32x2xf32>
    %cst_5 = arith.constant dense<0.000000e+00> : vector<2xf32>
    %9 = vector.multi_reduction <add>, %8, %cst_5 [0] : vector<32x2xf32> to vector<2xf32>
    %10 = vector.shape_cast %9 : vector<2xf32> to vector<1x2xf32>
    %c0_6 = arith.constant 0 : index
    %c0_7 = arith.constant 0 : index
    %11 = vector.load %arg3[%c0_6, %c0_7] : memref<1x2xf32, #tpu.memory_space<vmem>>, vector<1x2xf32>
    %12 = arith.addf %10, %11 : vector<1x2xf32>
    %cst_8 = arith.constant 0.000000e+00 : f32
    %13 = vector.broadcast %cst_8 : f32 to vector<1x2xf32>
    %14 = arith.maximumf %12, %13 : vector<1x2xf32>
    %c0_9 = arith.constant 0 : index
    %c0_10 = arith.constant 0 : index
    %15 = vector.load %arg4[%c0_9, %c0_10] : memref<32x2xf32, #tpu.memory_space<vmem>>, vector<32x2xf32>
    %16 = vector.broadcast %14 : vector<1x2xf32> to vector<32x2xf32>
    %17 = arith.mulf %15, %16 : vector<32x2xf32>
    %cst_11 = arith.constant dense<0.000000e+00> : vector<32xf32>
    %18 = vector.multi_reduction <add>, %17, %cst_11 [1] : vector<32x2xf32> to vector<32xf32>
    %19 = vector.shape_cast %18 : vector<32xf32> to vector<32x1xf32>
    %c0_12 = arith.constant 0 : index
    %c0_13 = arith.constant 0 : index
    %20 = vector.load %arg5[%c0_12, %c0_13] : memref<32x1xf32, #tpu.memory_space<vmem>>, vector<32x1xf32>
    %21 = arith.addf %19, %20 : vector<32x1xf32>
    %cst_14 = arith.constant 0.000000e+00 : f32
    %22 = vector.broadcast %cst_14 : f32 to vector<32x1xf32>
    %23 = arith.subf %22, %21 : vector<32x1xf32>
    %24 = math.exp %23 : vector<32x1xf32>
    %cst_15 = arith.constant 1.000000e+00 : f32
    %25 = vector.broadcast %cst_15 : f32 to vector<32x1xf32>
    %26 = arith.addf %25, %24 : vector<32x1xf32>
    %cst_16 = arith.constant 1.000000e+00 : f32
    %27 = vector.broadcast %cst_16 : f32 to vector<32x1xf32>
    %28 = arith.divf %27, %26 : vector<32x1xf32>
    %c0_17 = arith.constant 0 : index
    %c0_18 = arith.constant 0 : index
    %29 = vector.load %arg6[%c0_17, %c0_18] : memref<32x1xf32, #tpu.memory_space<vmem>>, vector<32x1xf32>
    %30 = vector.broadcast %29 : vector<32x1xf32> to vector<32x256xf32>
    %31 = arith.mulf %1, %30 : vector<32x256xf32>
    %cst_19 = arith.constant dense<0.000000e+00> : vector<256xf32>
    %32 = vector.multi_reduction <add>, %31, %cst_19 [0] : vector<32x256xf32> to vector<256xf32>
    %33 = vector.shape_cast %32 : vector<256xf32> to vector<1x256xf32>
    %c0_20 = arith.constant 0 : index
    %c0_21 = arith.constant 0 : index
    %34 = vector.load %arg7[%c0_20, %c0_21] : memref<1x1xf32, #tpu.memory_space<vmem>>, vector<1x1xf32>
    %35 = vector.broadcast %34 : vector<1x1xf32> to vector<1x256xf32>
    %36 = arith.addf %33, %35 : vector<1x256xf32>
    %cst_22 = arith.constant 0.000000e+00 : f32
    %37 = vector.broadcast %cst_22 : f32 to vector<1x256xf32>
    %38 = arith.subf %37, %36 : vector<1x256xf32>
    %39 = math.exp %38 : vector<1x256xf32>
    %cst_23 = arith.constant 1.000000e+00 : f32
    %40 = vector.broadcast %cst_23 : f32 to vector<1x256xf32>
    %41 = arith.addf %40, %39 : vector<1x256xf32>
    %cst_24 = arith.constant 1.000000e+00 : f32
    %42 = vector.broadcast %cst_24 : f32 to vector<1x256xf32>
    %43 = arith.divf %42, %41 : vector<1x256xf32>
    %44 = vector.broadcast %28 : vector<32x1xf32> to vector<32x256xf32>
    %45 = vector.broadcast %43 : vector<1x256xf32> to vector<32x256xf32>
    %46 = arith.addf %44, %45 : vector<32x256xf32>
    %47 = arith.mulf %1, %46 : vector<32x256xf32>
    %c0_25 = arith.constant 0 : index
    %c0_26 = arith.constant 0 : index
    %c0_27 = arith.constant 0 : index
    %48 = vector.load %arg8[%c0_25, %c0_26, %c0_27] : memref<1x32x256xf32, #tpu.memory_space<vmem>>, vector<1x32x256xf32>
    %49 = vector.shape_cast %48 : vector<1x32x256xf32> to vector<32x256xf32>
    %50 = vector.shape_cast %47 : vector<32x256xf32> to vector<1x32x256xf32>
    tpu.vector_store %arg8[%c0_25, %c0_26, %c0_27], %50 {strides = array<i32>} : memref<1x32x256xf32, #tpu.memory_space<vmem>>, vector<1x32x256xf32>,
    return
  }
  func.func @transform_0(%arg0: i32) -> (i32, i32, i32) {
    %c0_i32 = arith.constant 0 : i32
    %c0_i32_0 = arith.constant 0 : i32
    %c0_i32_1 = arith.constant 0 : i32
    return %arg0, %c0_i32, %c0_i32_0 : i32, i32, i32
  }
  func.func @transform_1(%arg0: i32) -> (i32, i32) {
    %c0_i32 = arith.constant 0 : i32
    %c0_i32_0 = arith.constant 0 : i32
    %c0_i32_1 = arith.constant 0 : i32
    return %c0_i32, %c0_i32_0 : i32, i32
  }
  func.func @transform_2(%arg0: i32) -> (i32, i32) {
    %c0_i32 = arith.constant 0 : i32
    %c0_i32_0 = arith.constant 0 : i32
    %c0_i32_1 = arith.constant 0 : i32
    return %c0_i32, %c0_i32_0 : i32, i32
  }
  func.func @transform_3(%arg0: i32) -> (i32, i32) {
    %c0_i32 = arith.constant 0 : i32
    %c0_i32_0 = arith.constant 0 : i32
    %c0_i32_1 = arith.constant 0 : i32
    return %c0_i32, %c0_i32_0 : i32, i32
  }
  func.func @transform_4(%arg0: i32) -> (i32, i32) {
    %c0_i32 = arith.constant 0 : i32
    %c0_i32_0 = arith.constant 0 : i32
    %c0_i32_1 = arith.constant 0 : i32
    return %c0_i32, %c0_i32_0 : i32, i32
  }
  func.func @transform_5(%arg0: i32) -> (i32, i32) {
    %c0_i32 = arith.constant 0 : i32
    %c0_i32_0 = arith.constant 0 : i32
    %c0_i32_1 = arith.constant 0 : i32
    return %c0_i32, %c0_i32_0 : i32, i32
  }
  func.func @transform_6(%arg0: i32) -> (i32, i32) {
    %c0_i32 = arith.constant 0 : i32
    %c0_i32_0 = arith.constant 0 : i32
    %c0_i32_1 = arith.constant 0 : i32
    return %c0_i32, %c0_i32_0 : i32, i32
  }
  func.func @transform_7(%arg0: i32) -> (i32, i32, i32) {
    %c0_i32 = arith.constant 0 : i32
    %c0_i32_0 = arith.constant 0 : i32
    %c0_i32_1 = arith.constant 0 : i32
    return %arg0, %c0_i32, %c0_i32_0 : i32, i32, i32
  }
}

</mosaic_0001>

<bundles_post_ra>
// kernel: tpu_custom_call.1
= control target key start
LH: loop header
LB: loop body
LE: loop exit
PB: predicated region body
PF: predicated region fallthrough
CT: control target
= control target key end

     0   :  { %s982_s0 = inlined_call_operand.vmem [shape: f32[2,32,256], index: 0, kind: input, shape index: {}]   ;;  %s983_s1 = inlined_call_operand.vmem [shape: f32[32,2], index: 1, kind: input, shape index: {}]   ;;  %s984_s2 = inlined_call_operand.vmem [shape: f32[1,2], index: 2, kind: input, shape index: {}]   ;;  %s985_s3 = inlined_call_operand.vmem [shape: f32[32,2], index: 3, kind: input, shape index: {}]   ;;  %s986_s4 = inlined_call_operand.vmem [shape: f32[32,1], index: 4, kind: input, shape index: {}]   ;;  %s987_s5 = inlined_call_operand.vmem [shape: f32[32,1], index: 5, kind: input, shape index: {}]   ;;  %s988_s6 = inlined_call_operand.<no memory space> [shape: f32[1,1], index: 6, kind: input, shape index: {}]   ;;  %s989_s7 = inlined_call_operand.hbm [shape: f32[2,32,256], index: 7, kind: output, shape index: {}]  }
   0x1   :  { %v12_v0 = vstv %s988_s6 }
   0x2   :  { %13 = vst [vmem:[#allocation2] sm:$0x1] %v12_v0 }
   0x3   :  { %14 = vsyncpa [#allocation4], 0 }
   0x4   :  { %16 = vsyncpa [#allocation4 + $0x1], 0  ;;  %s770_s26 = smov 0   ;;  %s772_s27 = smov 0  }
   0x5   :  { %s774_s28 = smov 0   ;;  %s776_s29 = smov 0  }
   0x6 LB: > { %s791_s6 = sadd.s32 4294967295, %s721_s29   ;;  %s579_s30 = sadd.s32 4294967294, %s721_s29   ;;  %s721_s29 = sphi %s776_s29, %s995_s29   ;;  %s717_s28 = sphi %s774_s28, %s994_s28   ;;  %s713_s27 = sphi %s772_s27, %s993_s27   ;;  %s709_s26 = sphi %s770_s26, %s992_s26  }
   0x7   : > { %s795_s8 = sadd.s32 1, %s721_s29   ;;  %s181_s9 = sadd.s32 1, %s717_s28 }
   0x8   : > { %s178_s10 = ssub.s32 %s721_s29, %s795_s8  ;;  %p191_p0 = scmp.ne.s32.totalorder %s717_s28, %s713_s27 }
   0x9   : > { %p179_p1 = scmp.eq.s32.totalorder %s178_s10, 0  ;;  %p192_p2 = scmp.eq.s32.totalorder %s791_s6, 1 }
   0xa   : > { %p197_p3 = scmp.ne.s32.totalorder %s713_s27, %s709_s26  ;;  %p198_p4 = scmp.eq.s32.totalorder %s579_s30, 1 }
   0xb   : > { %s806_s11 = scalar_select %p179_p1, %s717_s28, %s181_s9  }
   0xc   : > { %p808_p5 = por %p192_p2, %p191_p0  ;;  %p812_p6 = por %p198_p4, %p197_p3 }
   0xd   : > { %p582_p7 = scmp.ge.s32.totalorder %s721_s29, 1  ;;  %p242_p8 = scmp.lt.s32.totalorder %s721_s29, 3 }
   0xf   : > { %p243_p9 = pnand %p582_p7, %p242_p8 }
  0x10   : > { %p274_p10 = scmp.lt.s32.totalorder (!%p243_p9), %s791_s6, 1  ;;  %s271_s23 = sand.u32 (!%p243_p9), 1, %s713_s27  }
  0x11   : > { %246 = sbr.rel (%p243_p9) target bundleno = 532 (0x214), region = 48  ;;  %s583_s24 = sshll.u32 (!%p243_p9), %s271_s23, 6 }
  0x12   : > { %s273_s25 = scalar_lea.vmem (!%p243_p9), [#allocation3], %s583_s24  ;;  %s592_s30 = sshll.u32 (!%p243_p9), %s791_s6, 10 }
  0x13   : > { %s517_s9 = sshll.u32 (!%p243_p9), %s273_s25, 4  ;;  %s724_s17 = smov (!%p243_p9), [#allocation3]   ;;  %s936_s9 = int_to_ptr.vmem [resolvable:$true] %s517_s9 }
  0x14   : > { %s661_s16 = scalar_lea.vmem (!%p243_p9), %s936_s9, 1024 }
  0x15   : > { %p662_p11 = scmp.ne.s32.totalorder (!%p243_p9), %s936_s9, %s661_s16 }
  0x16   : > { %s275_s14 = scalar_select %p274_p10, %s791_s6, 1  ;;  %v723_v13 = vmov 0   ;;  %v304_v17 = vld [vmem:[%s983_s1] sm:$0xff]  ;;  %v306_v19 = vld [vmem:[%s983_s1 + $0x10] sm:$0xff]  ;;  %v305_v20 = vld [vmem:[%s983_s1 + $0x8] sm:$0xff]  ;;  %vm312_vm0 = vcmask 15360   ;;  %v333_v40 = vlaneseq }
  0x17   : > { %636 = vset.pattern.permute.xlu1 %v723_v13  ;;  %635 = vset.pattern.permute.xlu0 %v723_v13  ;;  %v307_v24 = vld [vmem:[%s983_s1 + $0x18] sm:$0xff]  ;;  %v326_v44 = vld [vmem:[%s984_s2] sm:$0x1]  ;;  %v330_v49 = vld [vmem:[%s985_s3 + $0x8] sm:$0xff]  ;;  %s942_s6 = scalar_lea.sflag [#allocation4], %s271_s23  ;;  %p663_p12 = pnand %p662_p11, %p808_p5 }
  0x18   : > { %s591_s15 = sshll.u32 %s275_s14, 6  ;;  %v863_v43 = vshrl.u32 %v333_v40, 7  ;;  %v329_v50 = vld [vmem:[%s985_s3] sm:$0xff]  ;;  %v332_v52 = vld [vmem:[%s985_s3 + $0x18] sm:$0xff]  ;;  %v331_v53 = vld [vmem:[%s985_s3 + $0x10] sm:$0xff] }
  0x19   : > { %s278_s18 = scalar_lea.vmem %s982_s0, %s591_s15  ;;  %v386_v62 = vld [vmem:[%s987_s5 + $0x8] sm:$0xff]  ;;  %v387_v63 = vld [vmem:[%s987_s5 + $0x10] sm:$0xff]  ;;  %v385_v0 = vld [vmem:[%s987_s5] sm:$0xff]  ;;  %s934_s15 = scalar_lea.hbm %s989_s7, %s592_s30 }
  0x1a   : > { %v823_v1 = vld [vmem:[%s278_s18] sm:$0xff]  ;;  %v825_v2 = vld [vmem:[%s278_s18 + $0x8] sm:$0xff]  ;;  %v833_v6 = vld [vmem:[%s278_s18 + $0x10] sm:$0xff]  ;;  %v335_v47 = vsub.s32 0, %v863_v43  ;;  %p664_p13 = pneg %p663_p12 }
  0x1b   : > { %v827_v3 = vld [vmem:[%s278_s18 + $0x20] sm:$0xff]  ;;  %v287_v4 = vadd.f32 %v825_v2, %v823_v1  ;;  %v831_v5 = vld [vmem:[%s278_s18 + $0x28] sm:$0xff]  ;;  %v835_v7 = vld [vmem:[%s278_s18 + $0x18] sm:$0xff] }
  0x1c   : > { %v293_v8 = vadd.f32 %v831_v5, %v827_v3  ;;  %v839_v9 = vld [vmem:[%s278_s18 + $0x30] sm:$0xff]  ;;  %v841_v10 = vld [vmem:[%s278_s18 + $0x38] sm:$0xff]  ;;  %v290_v11 = vadd.f32 %v835_v7, %v833_v6  ;;  %s665_s18 = sshll.u32 %s724_s17, 4  ;;  %s666_s18 = int_to_ptr.vmem [resolvable:$false] %s665_s18 }
  0x1d   : > { %288 = vadd.xlane.f32.xlu0 %v287_v4  ;;  %v296_v12 = vadd.f32 %v841_v10, %v839_v9  ;;  %v388_v4 = vld [vmem:[%s987_s5 + $0x18] sm:$0xff]  ;;  %s667_s19 = scalar_lea.vmem %s666_s18, 2048  ;;  %p668_p0 = scmp.lt.s32.totalorder %s936_s9, %s666_s18 }
  0x1e   : > { %294 = vadd.xlane.f32.xlu1 %v293_v8  ;;  %v435_v8 = vld [vmem:[#allocation2] sm:$0x1]  ;;  %p669_p1 = scmp.lt.s32.totalorder %s667_s19, %s661_s16 }
  0x20   : > { %p670_p2 = por %p669_p1, %p668_p0 }
  0x21   : > { %291 = vadd.xlane.f32.xlu0 %v290_v11  ;;  %v354_v11 = vld [vmem:[%s986_s4 + $0x8] sm:$0xff] }
  0x22   : > { %297 = vadd.xlane.f32.xlu1 %v296_v12  ;;  %v353_v12 = vld [vmem:[%s986_s4] sm:$0xff]  ;;  %p671_p3 = pnand %p670_p2, %p664_p13 }
  0xa6   : > { %v289_v14 = vpop.xlane.xlu0 %288 }
  0xa7   : > { %v300_v15 = vmul.f32 0.00390625, %v289_v14  ;;  %v295_v16 = vpop.xlane.xlu1 %294 }
  0xa8   : > { %v302_v18 = vmul.f32 0.00390625, %v295_v16 }
  0xa9   : > { %v308_v22 = vmul.f32 %v304_v17, %v300_v15  ;;  %v356_v17 = vld [vmem:[%s986_s4 + $0x18] sm:$0xff] }
  0xaa   : > { %v292_v21 = vpop.xlane.xlu0 %291  ;;  %v310_v27 = vmul.f32 %v306_v19, %v302_v18  ;;  %v355_v18 = vld [vmem:[%s986_s4 + $0x10] sm:$0xff] }
  0xab   : > { %v301_v23 = vmul.f32 0.00390625, %v292_v21  ;;  %v298_v25 = vpop.xlane.xlu1 %297  ;;  %v313_v30 = vsel %vm312_vm0, %v308_v22, 0.0 }
  0xac   : > { %v303_v26 = vmul.f32 0.00390625, %v298_v25  ;;  %v316_v33 = vsel %vm312_vm0, %v310_v27, 0.0 }
  0xad   : > { %v309_v28 = vmul.f32 %v305_v20, %v301_v23 }
  0xae   : > { %v311_v29 = vmul.f32 %v307_v24, %v303_v26 }
  0xaf   : > { %v314_v31 = vsel %vm312_vm0, %v309_v28, 0.0 }
  0xb0   : > { %v315_v32 = vadd.f32 %v314_v31, %v313_v30  ;;  %v318_v34 = vsel %vm312_vm0, %v311_v29, 0.0 }
  0xb2   : > { %v317_v35 = vadd.f32 %v316_v33, %v315_v32 }
  0xb4   : > { %v319_v36 = vadd.f32 %v318_v34, %v317_v35 }
  0xb6   : > { %v320_v37 = vrot.slane %v319_v36, 4 }
  0xb8   : > { %v321_v38 = vadd.f32 %v320_v37, %v319_v36 }
  0xba   : > { %v322_v39 = vrot.slane %v321_v38, 2 }
  0xbc   : > { %v323_v41 = vadd.f32 %v322_v39, %v321_v38 }
  0xbe   : > { %v324_v42 = vrot.slane %v323_v41, 1 }
  0xc0   : > { %v325_v45 = vadd.f32 %v324_v42, %v323_v41 }
  0xc2   : > { %v327_v46 = vadd.f32 %v326_v44, %v325_v45 }
  0xc4   : > { %v328_v48 = vmax.f32 %v327_v46, 0.0 }
  0xc6   : > { %v336_v51 = vrot.slane %v328_v48, %v335_v47 }
  0xc8   : > { %v338_v54 = vmul.f32 %v336_v51, %v330_v49  ;;  %v337_v55 = vmul.f32 %v336_v51, %v329_v50  ;;  %v340_v58 = vmul.f32 %v336_v51, %v332_v52  ;;  %v339_v59 = vmul.f32 %v336_v51, %v331_v53 }
  0xca   : > { %v344_v56 = vsel %vm312_vm0, %v338_v54, 0.0  ;;  %v341_v57 = vsel %vm312_vm0, %v337_v55, 0.0  ;;  %v350_v60 = vsel %vm312_vm0, %v340_v58, 0.0  ;;  %v347_v61 = vsel %vm312_vm0, %v339_v59, 0.0 }
  0xcb   : > { %345 = vadd.xlane.f32.xlu1 %v344_v56  ;;  %342 = vadd.xlane.f32.xlu0 %v341_v57 }
  0xcf   : > { %351 = vadd.xlane.f32.xlu1 %v350_v60  ;;  %348 = vadd.xlane.f32.xlu0 %v347_v61 }
  0xe0   : > { %396 = vperm.xlu1 %636, %v386_v62  }
  0xe4   : > { %401 = vperm.xlu1 %636, %v387_v63  }
  0xe5   : > { %391 = vperm.xlu0 %635, %v385_v0  }
  0xe8   : > { %406 = vperm.xlu1 %636, %v388_v4  }
  0xec   : > { %438 = vperm.xlu1 %636, %v435_v8  }
 0x154   : > { %v346_v13 = vpop.xlane.xlu1 %345  ;;  %v343_v14 = vpop.xlane.xlu0 %342 }
 0x155   : > { %v358_v15 = vadd.f32 %v354_v11, %v346_v13  ;;  %v357_v16 = vadd.f32 %v353_v12, %v343_v14 }
 0x157   : > { %v362_v19 = vsub.f32 0.0, %v358_v15  ;;  %v361_v20 = vsub.f32 0.0, %v357_v16 }
 0x158   : > { %v352_v21 = vpop.xlane.xlu1 %351  ;;  %v349_v22 = vpop.xlane.xlu0 %348 }
 0x159   : > { %v367_v23 = vmul.f32 1.442695, %v362_v19  ;;  %v365_v24 = vmul.f32 1.442695, %v361_v20  ;;  %v360_v25 = vadd.f32 %v356_v17, %v352_v21  ;;  %v359_v26 = vadd.f32 %v355_v18, %v349_v22 }
 0x15b   : > { %637 = vpow2.f32 %v367_v23  ;;  %v363_v27 = vsub.f32 0.0, %v359_v26  ;;  %v364_v28 = vsub.f32 0.0, %v360_v25 }
 0x15c   : > { %639 = vpow2.f32 %v365_v24  ;;  %v397_v44 = vpop.permute.xlu1 %396 }
 0x15d   : > { %v369_v29 = vmul.f32 1.442695, %v363_v27  ;;  %v371_v30 = vmul.f32 1.442695, %v364_v28  ;;  %v411_v48 = vmul.f32 %v397_v44, %v833_v6  ;;  %v412_v50 = vmul.f32 %v397_v44, %v835_v7 }
 0x15f   : > { %641 = vpow2.f32 %v369_v29 }
 0x160   : > { %643 = vpow2.f32 %v371_v30  ;;  %v392_v45 = vpop.permute.xlu0 %391  ;;  %v402_v46 = vpop.permute.xlu1 %401 }
 0x161   : > { %v409_v49 = vmul.f32 %v392_v45, %v823_v1  ;;  %v410_v51 = vmul.f32 %v392_v45, %v825_v2  ;;  %v413_v52 = vmul.f32 %v402_v46, %v827_v3  ;;  %v414_v54 = vmul.f32 %v402_v46, %v831_v5 }
 0x163   : > { %v417_v53 = vadd.f32 %v411_v48, %v409_v49  ;;  %v426_v55 = vadd.f32 %v412_v50, %v410_v51 }
 0x164   : > { %v407_v56 = vpop.permute.xlu1 %406 }
 0x165   : > { %v418_v57 = vadd.f32 %v417_v53, %v413_v52  ;;  %v415_v58 = vmul.f32 %v407_v56, %v839_v9  ;;  %v427_v59 = vadd.f32 %v426_v55, %v414_v54  ;;  %v416_v60 = vmul.f32 %v407_v56, %v841_v10 }
 0x167   : > { %v419_v61 = vadd.f32 %v418_v57, %v415_v58  ;;  %v428_v62 = vadd.f32 %v427_v59, %v416_v60 }
 0x168   : > { %v638_v31 = vpop.eup %637  ;;  %v439_v16 = vpop.permute.xlu1 %438 }
 0x169   : > { %v640_v32 = vpop.eup %639  ;;  %v374_v34 = vadd.f32 1.0, %v638_v31  ;;  %v420_v63 = vrot.slane %v419_v61, 4  ;;  %v429_v0 = vrot.slane %v428_v62, 4  ;;  %v444_v19 = vrot.slane %v439_v16, %v335_v47 }
 0x16a   : > { %v373_v33 = vadd.f32 1.0, %v640_v32 }
 0x16b   : > { %v421_v4 = vadd.f32 %v420_v63, %v419_v61  ;;  %v430_v8 = vadd.f32 %v429_v0, %v428_v62 }
 0x16c   : > { %645 = vrcp.f32 %v373_v33  ;;  %v642_v35 = vpop.eup %641 }
 0x16d   : > { %647 = vrcp.f32 %v374_v34  ;;  %v375_v36 = vadd.f32 1.0, %v642_v35  ;;  %v644_v37 = vpop.eup %643  ;;  %v422_v11 = vrot.slane %v421_v4, 2  ;;  %v431_v12 = vrot.slane %v430_v8, 2 }
 0x16e   : > { %v376_v38 = vadd.f32 1.0, %v644_v37 }
 0x16f   : > { %649 = vrcp.f32 %v375_v36  ;;  %v423_v13 = vadd.f32 %v422_v11, %v421_v4  ;;  %v432_v14 = vadd.f32 %v431_v12, %v430_v8 }
 0x170   : > { %651 = vrcp.f32 %v376_v38 }
 0x171   : > { %v424_v15 = vrot.slane %v423_v13, 1  ;;  %v433_v17 = vrot.slane %v432_v14, 1 }
 0x173   : > { %v425_v18 = vadd.f32 %v424_v15, %v423_v13  ;;  %v434_v20 = vadd.f32 %v433_v17, %v432_v14 }
 0x175   : > { %v445_v21 = vadd.f32 %v444_v19, %v425_v18  ;;  %v446_v22 = vadd.f32 %v444_v19, %v434_v20 }
 0x177   : > { %v447_v23 = vsub.f32 0.0, %v445_v21  ;;  %v448_v24 = vsub.f32 0.0, %v446_v22 }
 0x179   : > { %v646_v39 = vpop.eup %645  ;;  %v449_v25 = vmul.f32 1.442695, %v447_v23  ;;  %v451_v26 = vmul.f32 1.442695, %v448_v24 }
 0x17a   : > { %461 = vperm.xlu1 %636, %v646_v39   ;;  %v648_v40 = vpop.eup %647 }
 0x17b   : > { %653 = vpow2.f32 %v449_v25 }
 0x17c   : > { %v650_v41 = vpop.eup %649  ;;  %655 = vpow2.f32 %v451_v26 }
 0x17d   : > { %v652_v42 = vpop.eup %651 }
 0x17e   : > { %466 = vperm.xlu1 %636, %v648_v40  }
 0x182   : > { %471 = vperm.xlu1 %636, %v650_v41  }
 0x186   : > { %476 = vperm.xlu1 %636, %v652_v42  }
 0x188   : > { %v654_v27 = vpop.eup %653 }
 0x189   : > { %v656_v28 = vpop.eup %655  ;;  %v453_v29 = vadd.f32 1.0, %v654_v27 }
 0x18a   : > { %v454_v30 = vadd.f32 1.0, %v656_v28 }
 0x18b   : > { %657 = vrcp.f32 %v453_v29 }
 0x18c   : > { %659 = vrcp.f32 %v454_v30 }
 0x198   : > { %v658_v43 = vpop.eup %657 }
 0x199   : > { %v660_v47 = vpop.eup %659 }
 0x1f5   : > { %v462_v31 = vpop.permute.xlu1 %461 }
 0x1f6   : > { %v479_v32 = vadd.f32 %v658_v43, %v462_v31  ;;  %v480_v33 = vadd.f32 %v660_v47, %v462_v31 }
 0x1f8   : > { %v487_v34 = vmul.f32 %v479_v32, %v823_v1  ;;  %v488_v35 = vmul.f32 %v480_v33, %v825_v2 }
 0x1f9   : > { %v467_v36 = vpop.permute.xlu1 %466 }
 0x1fa   : > { %495 = vst [vmem:[%s273_s25] sm:$0xff] %v487_v34  ;;  %496 = vst [vmem:[%s273_s25 + $0x8] sm:$0xff] %v488_v35  ;;  %v481_v37 = vadd.f32 %v658_v43, %v467_v36  ;;  %v482_v38 = vadd.f32 %v660_v47, %v467_v36 }
 0x1fc   : > { %v489_v39 = vmul.f32 %v481_v37, %v833_v6  ;;  %v490_v40 = vmul.f32 %v482_v38, %v835_v7 }
 0x1fd   : > { %v472_v41 = vpop.permute.xlu1 %471 }
 0x1fe   : > { %497 = vst [vmem:[%s273_s25 + $0x10] sm:$0xff] %v489_v39  ;;  %498 = vst [vmem:[%s273_s25 + $0x18] sm:$0xff] %v490_v40  ;;  %v483_v42 = vadd.f32 %v658_v43, %v472_v41  ;;  %v484_v44 = vadd.f32 %v660_v47, %v472_v41 }
 0x200   : > { %v491_v1 = vmul.f32 %v483_v42, %v827_v3  ;;  %v492_v2 = vmul.f32 %v484_v44, %v831_v5 }
 0x201   : > { %v477_v45 = vpop.permute.xlu1 %476 }
 0x202   : > { %499 = vst [vmem:[%s273_s25 + $0x20] sm:$0xff] %v491_v1  ;;  %500 = vst [vmem:[%s273_s25 + $0x28] sm:$0xff] %v492_v2  ;;  %v485_v46 = vadd.f32 %v658_v43, %v477_v45  ;;  %v486_v6 = vadd.f32 %v660_v47, %v477_v45 }
 0x204   : > { %v493_v3 = vmul.f32 %v485_v46, %v839_v9  ;;  %v494_v5 = vmul.f32 %v486_v6, %v841_v10 }
 0x206   : > { %501 = vst [vmem:[%s273_s25 + $0x30] sm:$0xff] %v493_v3  ;;  %502 = vst [vmem:[%s273_s25 + $0x38] sm:$0xff] %v494_v5 }
 0x207   : > { %674 = shalt.err (!%p671_p3)
}
 0x208   : > { %s675_s20 = scalar_lea.hbm %s934_s15, 1024  ;;  %s679_s23 = scalar_lea.hbm %s989_s7, 2048 }
 0x209   : > { %p676_p4 = scmp.ne.s32.totalorder %s934_s15, %s675_s20  ;;  %p680_p9 = scmp.lt.s32.totalorder %s934_s15, %s989_s7 }
 0x20a   : > { %p681_p10 = scmp.lt.s32.totalorder %s679_s23, %s675_s20 }
 0x20b   : > { %p677_p7 = pnand %p676_p4, %p808_p5 }
 0x20c   : > { %p682_p11 = por %p681_p10, %p680_p9 }
 0x20d   : > { %p678_p8 = pneg %p677_p7 }
 0x20f   : > { %p683_p12 = pnand %p682_p11, %p678_p8 }
 0x211   : > { %686 = shalt.err (!%p683_p12)
}
 0x212   : > { %s725_s30 = smov 256   ;;  %s726_s10 = smov 16  }
 0x213   : > { %593 = dma.vmem_to_hbm [thread:$0]  (%p808_p5), %s936_s9, 1024, %s934_s15, %s942_s6, %s725_s30, %s725_s30, %s726_s10  }
 0x214 PF: > { %p599_p13 = scmp.ge.s32.totalorder %s721_s29, 2  ;;  %s532_s14 = sand.u32 1, %s709_s26  }
 0x215   : > { %s533_s16 = scalar_lea.sflag [#allocation4], %s532_s14 }
 0x216   : > { %p596_p0 = pnand %p599_p13, %p812_p6 }
 0x218   : > { %p597_p1 = pneg %p596_p0 }
 0x21a   : > { %704 = dma.done.wait (%p597_p1), %s533_s16, 1024  }
 0x21b   : > { %706 = vsyncadd (%p597_p1), %s533_s16, 4294966272  ;;  %p19_p2 = scmp.ge.s32.totalorder %s795_s8, 4   ;;  %s992_s26 = smov %s713_s27 }
 0x21c   : > { %s993_s27 = smov %s717_s28  ;;  %s994_s28 = smov %s806_s11 }
 0x21d   : > { %s995_s29 = smov %s795_s8  ;;  %21 = sbr.rel (!%p19_p2) target bundleno = 6 (0x6), region = 83 }
 0x222   :  { %538 = vsyncpa [#allocation4], 1 }
 0x223   :  { %540 = vsyncpa [#allocation4 + $0x1], 1 }

</bundles_post_ra>
